<compile_context>
chip_gen: v5e
topology: v5e:2x2
jax: 0.10.0
libtpu: 0.0.40
codegen_flags: <defaults>
</compile_context>

<pallas_src>
import functools
import math

import jax
import jax.numpy as jnp
from jax import lax
from jax.experimental import pallas as pl
from jax.experimental.pallas import tpu as pltpu


# tanh-GELU lowers to the EUP slot (near-free next to the MXU); set False to
# match F.gelu's exact erf bit-for-bit-ish at the cost of a VALU-bound kernel.
_APPROXIMATE_GELU = True
_NEG_BIG = -1e30  # padded logit lanes -> exp() == 0 inside the softmax


def _round_up(x, m):
    return ((x + m - 1) // m) * m


def _gelu(x):
    if _APPROXIMATE_GELU:
        return jax.nn.gelu(x, approximate=True)
    # PyTorch F.gelu default: 0.5 * x * (1 + erf(x / sqrt(2)))
    return 0.5 * x * (1.0 + lax.erf(x * (1.0 / math.sqrt(2.0))))


def _nan_to_num(x):
    # torch.nan_to_num defaults: nan -> 0, +/-inf -> finite max/min (f32).
    big = jnp.float32(jnp.finfo(jnp.float32).max)
    x = jnp.where(jnp.isnan(x), jnp.float32(0.0), x)
    return jnp.clip(x, -big, big)


def _make_kernel(with_q):
    def kernel(*refs):
        if with_q:
            (x_ref, w1_ref, b1_ref, w2_ref, b2_ref, w3_ref, b3_ref,
             w4_ref, b4_ref, sup_ref, probs_ref, q_ref) = refs
        else:
            (x_ref, w1_ref, b1_ref, w2_ref, b2_ref, w3_ref, b3_ref,
             w4_ref, b4_ref, probs_ref) = refs
            sup_ref = q_ref = None

        mm = w2_ref.dtype  # MXU operand dtype (bfloat16 by default)

        x = _nan_to_num(x_ref[...]).astype(mm)

        h = jnp.dot(x, w1_ref[...],
                    preferred_element_type=jnp.float32) + b1_ref[...]
        h = _gelu(h)

        h = jnp.dot(h.astype(mm), w2_ref[...],
                    preferred_element_type=jnp.float32) + b2_ref[...]
        h = _gelu(h)

        h = jnp.dot(h.astype(mm), w3_ref[...],
                    preferred_element_type=jnp.float32) + b3_ref[...]
        h = _gelu(h)

        logits = jnp.dot(h.astype(mm), w4_ref[...],
                         preferred_element_type=jnp.float32) + b4_ref[...]

        # Numerically stable softmax over the lane-dense (128-padded) atom axis.
        m = jnp.max(logits, axis=-1, keepdims=True)
        e = jnp.exp(logits - m)
        denom = jnp.sum(e, axis=-1, keepdims=True)
        # EUP approximate reciprocal + one Newton step (~1e-7 rel err).
        r = pl.reciprocal(denom, approx=True)
        r = r * (2.0 - denom * r)
        probs = e * r

        probs_ref[...] = probs.astype(probs_ref.dtype)
        if with_q:
            # Padded atom lanes: probs == 0 and support == 0, so no masking.
            q_ref[...] = jnp.sum(probs * sup_ref[...], axis=-1, keepdims=True)

    return kernel


def _tile_geometry(B, batch_tile):
    # bf16 operands pack 16 rows per sublane group -> round to 16, not 8.
    tb = max(16, min(_round_up(batch_tile, 16), _round_up(B, 16)))
    B_pad = _round_up(B, tb)
    # Guarantee >= 2 grid steps whenever the batch allows it: lets v7x's two
    # TensorCores split the "parallel" axis and gives the pipeline depth.
    if B_pad // tb < 2:
        half = _round_up((B_pad + 1) // 2, 16)
        if 16 <= half < tb:
            tb = half
            B_pad = _round_up(B, tb)
    return tb, B_pad


def distributional_critic_forward(state, action, params, *,
                                  batch_tile=2048,
                                  matmul_dtype=jnp.bfloat16,
                                  probs_dtype=jnp.float32,
                                  return_q=False,
                                  return_padded=False):
    """Full DSAC critic forward in a single batch-tiled Pallas kernel.

    probs_dtype=jnp.bfloat16 / return_padded=True are opt-in output-bandwidth
    optimizations (halve the probs write / skip the external slice copy); the
    defaults keep the exact f32 [B, num_atoms] contract of the PyTorch module.
    """
    state = jnp.asarray(state, jnp.float32)
    action = jnp.asarray(action, jnp.float32)
    if state.ndim == 1:
        state = state[None, :]
    if action.ndim == 1:
        action = action[None, :]

    (w1, b1), (w2, b2), (w3, b3), (w4, b4) = params
    w1 = jnp.asarray(w1, jnp.float32)
    w2 = jnp.asarray(w2, jnp.float32)
    w3 = jnp.asarray(w3, jnp.float32)
    w4 = jnp.asarray(w4, jnp.float32)

    B, S = state.shape
    A = action.shape[1]
    H = w1.shape[1]
    num_atoms = w4.shape[1]

    # ---- padding / tiling geometry -------------------------------------
    tb, B_pad = _tile_geometry(B, batch_tile)
    SA = S + A
    SA_pad = _round_up(SA, 16)         # fc1 contraction width (tiny)
    N_pad = _round_up(num_atoms, 128)  # lane-dense atom axis

    def pad2(x, rows, cols):
        return jnp.pad(x, ((0, rows - x.shape[0]), (0, cols - x.shape[1])))

    # Concat fused in the wrapper (cheap XLA concat on a narrow array), then
    # zero-padded to (B_pad, SA_pad); zero cols x zero W1 rows == no-op.
    x = jnp.concatenate([state, action], axis=-1)
    x_p = pad2(x, B_pad, SA_pad)

    w1_p = pad2(w1, SA_pad, H).astype(matmul_dtype)
    w2_p = w2.astype(matmul_dtype)
    w3_p = w3.astype(matmul_dtype)
    # Zero-pad W4 columns; padded logit lanes are killed via the bias below.
    w4_p = pad2(w4, H, N_pad).astype(matmul_dtype)

    b1r = jnp.asarray(b1, jnp.float32).reshape(1, H)
    b2r = jnp.asarray(b2, jnp.float32).reshape(1, H)
    b3r = jnp.asarray(b3, jnp.float32).reshape(1, H)
    b4r = (jnp.full((1, N_pad), _NEG_BIG, jnp.float32)
           .at[0, :num_atoms].set(jnp.asarray(b4, jnp.float32)))

    inputs = [x_p, w1_p, b1r, w2_p, b2r, w3_p, b3r, w4_p, b4r]
    if return_q:
        support_p = (jnp.zeros((1, N_pad), jnp.float32)
                     .at[0, :num_atoms]
                     .set(jnp.linspace(-10.0, 10.0, num_atoms)
                          .astype(jnp.float32)))
        inputs.append(support_p)

    # ---- specs ----------------------------------------------------------
    def const_spec(arr):
        # Same block index on every grid step -> fetched once, VMEM-resident.
        return pl.BlockSpec(arr.shape, lambda i: (0, 0))

    in_specs = [pl.BlockSpec((tb, SA_pad), lambda i: (i, 0))] + \
               [const_spec(a) for a in inputs[1:]]

    probs_spec = pl.BlockSpec((tb, N_pad), lambda i: (i, 0))
    if return_q:
        out_specs = [probs_spec, pl.BlockSpec((tb, 1), lambda i: (i, 0))]
        out_shape = (jax.ShapeDtypeStruct((B_pad, N_pad), probs_dtype),
                     jax.ShapeDtypeStruct((B_pad, 1), jnp.float32))
    else:
        out_specs = probs_spec
        out_shape = jax.ShapeDtypeStruct((B_pad, N_pad), probs_dtype)

    flops = 2 * B_pad * (SA_pad * H + 2 * H * H + H * N_pad)
    transcendentals = B_pad * (3 * H + N_pad)  # tanh(GELU) + exp(softmax)
    bytes_accessed = (sum(int(a.size) * a.dtype.itemsize for a in inputs)
                      + B_pad * N_pad * jnp.dtype(probs_dtype).itemsize
                      + (B_pad * 4 if return_q else 0))

    result = pl.pallas_call(
        _make_kernel(return_q),
        out_shape=out_shape,
        grid=(B_pad // tb,),
        in_specs=in_specs,
        out_specs=out_specs,
        compiler_params=pltpu.CompilerParams(
            dimension_semantics=("parallel",),     # megacore / v7x 2-TC split
            vmem_limit_bytes=48 * 1024 * 1024,     # explicit; fits v7x's 64 MiB
        ),
        cost_estimate=pl.CostEstimate(flops=flops,
                                      transcendentals=transcendentals,
                                      bytes_accessed=bytes_accessed),
    )(*inputs)

    if return_q:
        probs_pad, q_pad = result
    else:
        probs_pad, q_pad = result, None

    if return_padded:
        # Consumer must mask rows >= B and atom lanes >= num_atoms itself.
        return (probs_pad, q_pad) if return_q else probs_pad

    probs = probs_pad[:B, :num_atoms]
    if return_q:
        return probs, q_pad[:B]
    return probs


def init_params(key, state_dim, action_dim, hidden_dim=256, num_atoms=51):
    """Deterministic init mimicking nn.Linear (uniform +-1/sqrt(fan_in))."""
    dims = [(state_dim + action_dim, hidden_dim),
            (hidden_dim, hidden_dim),
            (hidden_dim, hidden_dim),
            (hidden_dim, num_atoms)]
    params = []
    for (fan_in, fan_out) in dims:
        key, kw, kb = jax.random.split(key, 3)
        bound = 1.0 / math.sqrt(fan_in)
        w = jax.random.uniform(kw, (fan_in, fan_out), jnp.float32, -bound, bound)
        b = jax.random.uniform(kb, (fan_out,), jnp.float32, -bound, bound)
        params.append((w, b))
    return params


def get_support(num_atoms=51):
    return jnp.linspace(-10.0, 10.0, num_atoms)


def get_qvalue(probs, num_atoms=51):
    support = get_support(num_atoms)
    return jnp.sum(probs * support[None, :], axis=-1, keepdims=True)


if __name__ == "__main__":
    # Small shapes consistent with the module (hidden/num_atoms at defaults).
    batch, state_dim, action_dim, hidden_dim, num_atoms = 2, 8, 4, 256, 51

    key = jax.random.PRNGKey(0)
    kp, ks, ka = jax.random.split(key, 3)
    params = init_params(kp, state_dim, action_dim, hidden_dim, num_atoms)

    state = jax.random.normal(ks, (batch, state_dim), jnp.float32)
    action = jax.random.normal(ka, (batch, action_dim), jnp.float32)

    # probs-only path (matches nn.Module.forward; no q output generated)
    probs_only = distributional_critic_forward(state, action, params)
    # fused-q path (forward + get_qvalue in one kernel)
    probs, q = distributional_critic_forward(state, action, params,
                                             return_q=True)
    probs_only, probs, q = jax.block_until_ready((probs_only, probs, q))

    # sanity: shapes, softmax rows sum to 1, non-negative, fused Q matches,
    # and both kernel variants agree on probs.
    assert probs_only.shape == (batch, num_atoms)
    assert probs.shape == (batch, num_atoms)
    assert q.shape == (batch, 1)
    assert bool(jnp.all(jnp.abs(jnp.sum(probs, axis=-1) - 1.0) < 1e-4))
    assert bool(jnp.all(probs >= 0.0))
    assert bool(jnp.all(jnp.abs(probs - probs_only) < 1e-6))
    q_ref = get_qvalue(probs, num_atoms)
    assert bool(jnp.all(jnp.abs(q - q_ref) < 1e-3))

    print("KERNEL_OK")
</pallas_src>

<mosaic_0001>
module attributes {stable_mosaic.version = 11 : i64} {
  func.func @kernel(%arg0: i32, %arg1: memref<16x16xf32, #tpu.memory_space<vmem>>, %arg2: memref<16x256xbf16, #tpu.memory_space<vmem>>, %arg3: memref<1x256xf32, #tpu.memory_space<vmem>>, %arg4: memref<256x256xbf16, #tpu.memory_space<vmem>>, %arg5: memref<1x256xf32, #tpu.memory_space<vmem>>, %arg6: memref<256x256xbf16, #tpu.memory_space<vmem>>, %arg7: memref<1x256xf32, #tpu.memory_space<vmem>>, %arg8: memref<256x128xbf16, #tpu.memory_space<vmem>>, %arg9: memref<1x128xf32, #tpu.memory_space<vmem>>, %arg10: memref<16x128xf32, #tpu.memory_space<vmem>>) attributes {dimension_semantics = [#tpu.dimension_semantics<parallel>], iteration_bounds = array<i64: 1>, scalar_prefetch = 0 : i64, scratch_operands = 0 : i64, tpu.core_type = #tpu.core_type<tc>, window_params = [{transform_indices = @transform_0, window_bounds = array<i64: 16, 16>}, {pipeline_mode = #tpu.pipeline_mode<synchronous>, transform_indices = @transform_1, window_bounds = array<i64: 16, 256>}, {pipeline_mode = #tpu.pipeline_mode<synchronous>, transform_indices = @transform_2, window_bounds = array<i64: 1, 256>}, {pipeline_mode = #tpu.pipeline_mode<synchronous>, transform_indices = @transform_3, window_bounds = array<i64: 256, 256>}, {pipeline_mode = #tpu.pipeline_mode<synchronous>, transform_indices = @transform_4, window_bounds = array<i64: 1, 256>}, {pipeline_mode = #tpu.pipeline_mode<synchronous>, transform_indices = @transform_5, window_bounds = array<i64: 256, 256>}, {pipeline_mode = #tpu.pipeline_mode<synchronous>, transform_indices = @transform_6, window_bounds = array<i64: 1, 256>}, {pipeline_mode = #tpu.pipeline_mode<synchronous>, transform_indices = @transform_7, window_bounds = array<i64: 256, 128>}, {pipeline_mode = #tpu.pipeline_mode<synchronous>, transform_indices = @transform_8, window_bounds = array<i64: 1, 128>}, {transform_indices = @transform_9, window_bounds = array<i64: 16, 128>}]} {
    %c0 = arith.constant 0 : index
    %c0_0 = arith.constant 0 : index
    %0 = vector.load %arg1[%c0, %c0_0] : memref<16x16xf32, #tpu.memory_space<vmem>>, vector<16x16xf32>
    %1 = arith.cmpf one, %0, %0 : vector<16x16xf32>
    %cst = arith.constant 0.000000e+00 : f32
    %2 = vector.broadcast %cst : f32 to vector<16x16xf32>
    %3 = arith.select %1, %2, %0 : vector<16x16xi1>, vector<16x16xf32>
    %cst_1 = arith.constant 0.000000e+00 : f32
    %cst_2 = arith.constant 3.40282347E+38 : f32
    %4 = arith.subf %cst_1, %cst_2 : f32
    %cst_3 = arith.constant 3.40282347E+38 : f32
    %5 = vector.broadcast %4 : f32 to vector<16x16xf32>
    %6 = arith.maximumf %5, %3 : vector<16x16xf32>
    %7 = vector.broadcast %cst_3 : f32 to vector<16x16xf32>
    %8 = arith.minimumf %7, %6 : vector<16x16xf32>
    %9 = arith.truncf %8 : vector<16x16xf32> to vector<16x16xbf16>
    %c0_4 = arith.constant 0 : index
    %c0_5 = arith.constant 0 : index
    %10 = vector.load %arg2[%c0_4, %c0_5] : memref<16x256xbf16, #tpu.memory_space<vmem>>, vector<16x256xbf16>
    %cst_6 = arith.constant dense<0.000000e+00> : vector<16x256xf32>
    %11 = tpu.matmul %9, %10, %cst_6 {dimension_numbers = #tpu.dot_dimension_numbers<[1], [0], [0], [1], [0, 0, 1, 1], [], []>} : vector<16x16xbf16>, vector<16x256xbf16>, vector<16x256xf32> -> vector<16x256xf32>
    %c0_7 = arith.constant 0 : index
    %c0_8 = arith.constant 0 : index
    %12 = vector.load %arg3[%c0_7, %c0_8] : memref<1x256xf32, #tpu.memory_space<vmem>>, vector<1x256xf32>
    %13 = vector.broadcast %12 : vector<1x256xf32> to vector<16x256xf32>
    %14 = arith.addf %11, %13 : vector<16x256xf32>
    %15 = arith.mulf %14, %14 : vector<16x256xf32>
    %16 = arith.mulf %14, %15 : vector<16x256xf32>
    %cst_9 = arith.constant 4.471500e-02 : f32
    %17 = vector.broadcast %cst_9 : f32 to vector<16x256xf32>
    %18 = arith.mulf %17, %16 : vector<16x256xf32>
    %19 = arith.addf %14, %18 : vector<16x256xf32>
    %cst_10 = arith.constant 0.797884583 : f32
    %20 = vector.broadcast %cst_10 : f32 to vector<16x256xf32>
    %21 = arith.mulf %20, %19 : vector<16x256xf32>
    %22 = math.tanh %21 : vector<16x256xf32>
    %cst_11 = arith.constant 1.000000e+00 : f32
    %23 = vector.broadcast %cst_11 : f32 to vector<16x256xf32>
    %24 = arith.addf %23, %22 : vector<16x256xf32>
    %cst_12 = arith.constant 5.000000e-01 : f32
    %25 = vector.broadcast %cst_12 : f32 to vector<16x256xf32>
    %26 = arith.mulf %25, %24 : vector<16x256xf32>
    %27 = arith.mulf %14, %26 : vector<16x256xf32>
    %28 = arith.truncf %27 : vector<16x256xf32> to vector<16x256xbf16>
    %c0_13 = arith.constant 0 : index
    %c0_14 = arith.constant 0 : index
    %29 = vector.load %arg4[%c0_13, %c0_14] : memref<256x256xbf16, #tpu.memory_space<vmem>>, vector<256x256xbf16>
    %cst_15 = arith.constant dense<0.000000e+00> : vector<16x256xf32>
    %30 = tpu.matmul %28, %29, %cst_15 {dimension_numbers = #tpu.dot_dimension_numbers<[1], [0], [0], [1], [0, 0, 1, 1], [], []>} : vector<16x256xbf16>, vector<256x256xbf16>, vector<16x256xf32> -> vector<16x256xf32>
    %c0_16 = arith.constant 0 : index
    %c0_17 = arith.constant 0 : index
    %31 = vector.load %arg5[%c0_16, %c0_17] : memref<1x256xf32, #tpu.memory_space<vmem>>, vector<1x256xf32>
    %32 = vector.broadcast %31 : vector<1x256xf32> to vector<16x256xf32>
    %33 = arith.addf %30, %32 : vector<16x256xf32>
    %34 = arith.mulf %33, %33 : vector<16x256xf32>
    %35 = arith.mulf %33, %34 : vector<16x256xf32>
    %cst_18 = arith.constant 4.471500e-02 : f32
    %36 = vector.broadcast %cst_18 : f32 to vector<16x256xf32>
    %37 = arith.mulf %36, %35 : vector<16x256xf32>
    %38 = arith.addf %33, %37 : vector<16x256xf32>
    %cst_19 = arith.constant 0.797884583 : f32
    %39 = vector.broadcast %cst_19 : f32 to vector<16x256xf32>
    %40 = arith.mulf %39, %38 : vector<16x256xf32>
    %41 = math.tanh %40 : vector<16x256xf32>
    %cst_20 = arith.constant 1.000000e+00 : f32
    %42 = vector.broadcast %cst_20 : f32 to vector<16x256xf32>
    %43 = arith.addf %42, %41 : vector<16x256xf32>
    %cst_21 = arith.constant 5.000000e-01 : f32
    %44 = vector.broadcast %cst_21 : f32 to vector<16x256xf32>
    %45 = arith.mulf %44, %43 : vector<16x256xf32>
    %46 = arith.mulf %33, %45 : vector<16x256xf32>
    %47 = arith.truncf %46 : vector<16x256xf32> to vector<16x256xbf16>
    %c0_22 = arith.constant 0 : index
    %c0_23 = arith.constant 0 : index
    %48 = vector.load %arg6[%c0_22, %c0_23] : memref<256x256xbf16, #tpu.memory_space<vmem>>, vector<256x256xbf16>
    %cst_24 = arith.constant dense<0.000000e+00> : vector<16x256xf32>
    %49 = tpu.matmul %47, %48, %cst_24 {dimension_numbers = #tpu.dot_dimension_numbers<[1], [0], [0], [1], [0, 0, 1, 1], [], []>} : vector<16x256xbf16>, vector<256x256xbf16>, vector<16x256xf32> -> vector<16x256xf32>
    %c0_25 = arith.constant 0 : index
    %c0_26 = arith.constant 0 : index
    %50 = vector.load %arg7[%c0_25, %c0_26] : memref<1x256xf32, #tpu.memory_space<vmem>>, vector<1x256xf32>
    %51 = vector.broadcast %50 : vector<1x256xf32> to vector<16x256xf32>
    %52 = arith.addf %49, %51 : vector<16x256xf32>
    %53 = arith.mulf %52, %52 : vector<16x256xf32>
    %54 = arith.mulf %52, %53 : vector<16x256xf32>
    %cst_27 = arith.constant 4.471500e-02 : f32
    %55 = vector.broadcast %cst_27 : f32 to vector<16x256xf32>
    %56 = arith.mulf %55, %54 : vector<16x256xf32>
    %57 = arith.addf %52, %56 : vector<16x256xf32>
    %cst_28 = arith.constant 0.797884583 : f32
    %58 = vector.broadcast %cst_28 : f32 to vector<16x256xf32>
    %59 = arith.mulf %58, %57 : vector<16x256xf32>
    %60 = math.tanh %59 : vector<16x256xf32>
    %cst_29 = arith.constant 1.000000e+00 : f32
    %61 = vector.broadcast %cst_29 : f32 to vector<16x256xf32>
    %62 = arith.addf %61, %60 : vector<16x256xf32>
    %cst_30 = arith.constant 5.000000e-01 : f32
    %63 = vector.broadcast %cst_30 : f32 to vector<16x256xf32>
    %64 = arith.mulf %63, %62 : vector<16x256xf32>
    %65 = arith.mulf %52, %64 : vector<16x256xf32>
    %66 = arith.truncf %65 : vector<16x256xf32> to vector<16x256xbf16>
    %c0_31 = arith.constant 0 : index
    %c0_32 = arith.constant 0 : index
    %67 = vector.load %arg8[%c0_31, %c0_32] : memref<256x128xbf16, #tpu.memory_space<vmem>>, vector<256x128xbf16>
    %cst_33 = arith.constant dense<0.000000e+00> : vector<16x128xf32>
    %68 = tpu.matmul %66, %67, %cst_33 {dimension_numbers = #tpu.dot_dimension_numbers<[1], [0], [0], [1], [0, 0, 1, 1], [], []>} : vector<16x256xbf16>, vector<256x128xbf16>, vector<16x128xf32> -> vector<16x128xf32>
    %c0_34 = arith.constant 0 : index
    %c0_35 = arith.constant 0 : index
    %69 = vector.load %arg9[%c0_34, %c0_35] : memref<1x128xf32, #tpu.memory_space<vmem>>, vector<1x128xf32>
    %70 = vector.broadcast %69 : vector<1x128xf32> to vector<16x128xf32>
    %71 = arith.addf %68, %70 : vector<16x128xf32>
    %cst_36 = arith.constant dense<0xFF800000> : vector<16xf32>
    %72 = vector.multi_reduction <maximumf>, %71, %cst_36 [1] : vector<16x128xf32> to vector<16xf32>
    %73 = vector.shape_cast %72 : vector<16xf32> to vector<16x1xf32>
    %74 = vector.broadcast %73 : vector<16x1xf32> to vector<16x128xf32>
    %75 = arith.subf %71, %74 : vector<16x128xf32>
    %76 = math.exp %75 : vector<16x128xf32>
    %cst_37 = arith.constant dense<0.000000e+00> : vector<16xf32>
    %77 = vector.multi_reduction <add>, %76, %cst_37 [1] : vector<16x128xf32> to vector<16xf32>
    %78 = vector.shape_cast %77 : vector<16xf32> to vector<16x1xf32>
    %79 = tpu.reciprocal %78 {approx = true} : vector<16x1xf32> -> vector<16x1xf32>
    %80 = arith.mulf %78, %79 : vector<16x1xf32>
    %cst_38 = arith.constant 2.000000e+00 : f32
    %81 = vector.broadcast %cst_38 : f32 to vector<16x1xf32>
    %82 = arith.subf %81, %80 : vector<16x1xf32>
    %83 = arith.mulf %79, %82 : vector<16x1xf32>
    %84 = vector.broadcast %83 : vector<16x1xf32> to vector<16x128xf32>
    %85 = arith.mulf %76, %84 : vector<16x128xf32>
    %c0_39 = arith.constant 0 : index
    %c0_40 = arith.constant 0 : index
    %86 = vector.load %arg10[%c0_39, %c0_40] : memref<16x128xf32, #tpu.memory_space<vmem>>, vector<16x128xf32>
    tpu.vector_store %arg10[%c0_39, %c0_40], %85 {strides = array<i32>} : memref<16x128xf32, #tpu.memory_space<vmem>>, vector<16x128xf32>,
    return
  }
  func.func @transform_0(%arg0: i32) -> (i32, i32) {
    %c0_i32 = arith.constant 0 : i32
    %c0_i32_0 = arith.constant 0 : i32
    return %arg0, %c0_i32 : i32, i32
  }
  func.func @transform_1(%arg0: i32) -> (i32, i32) {
    %c0_i32 = arith.constant 0 : i32
    %c0_i32_0 = arith.constant 0 : i32
    %c0_i32_1 = arith.constant 0 : i32
    return %c0_i32, %c0_i32_0 : i32, i32
  }
  func.func @transform_2(%arg0: i32) -> (i32, i32) {
    %c0_i32 = arith.constant 0 : i32
    %c0_i32_0 = arith.constant 0 : i32
    %c0_i32_1 = arith.constant 0 : i32
    return %c0_i32, %c0_i32_0 : i32, i32
  }
  func.func @transform_3(%arg0: i32) -> (i32, i32) {
    %c0_i32 = arith.constant 0 : i32
    %c0_i32_0 = arith.constant 0 : i32
    %c0_i32_1 = arith.constant 0 : i32
    return %c0_i32, %c0_i32_0 : i32, i32
  }
  func.func @transform_4(%arg0: i32) -> (i32, i32) {
    %c0_i32 = arith.constant 0 : i32
    %c0_i32_0 = arith.constant 0 : i32
    %c0_i32_1 = arith.constant 0 : i32
    return %c0_i32, %c0_i32_0 : i32, i32
  }
  func.func @transform_5(%arg0: i32) -> (i32, i32) {
    %c0_i32 = arith.constant 0 : i32
    %c0_i32_0 = arith.constant 0 : i32
    %c0_i32_1 = arith.constant 0 : i32
    return %c0_i32, %c0_i32_0 : i32, i32
  }
  func.func @transform_6(%arg0: i32) -> (i32, i32) {
    %c0_i32 = arith.constant 0 : i32
    %c0_i32_0 = arith.constant 0 : i32
    %c0_i32_1 = arith.constant 0 : i32
    return %c0_i32, %c0_i32_0 : i32, i32
  }
  func.func @transform_7(%arg0: i32) -> (i32, i32) {
    %c0_i32 = arith.constant 0 : i32
    %c0_i32_0 = arith.constant 0 : i32
    %c0_i32_1 = arith.constant 0 : i32
    return %c0_i32, %c0_i32_0 : i32, i32
  }
  func.func @transform_8(%arg0: i32) -> (i32, i32) {
    %c0_i32 = arith.constant 0 : i32
    %c0_i32_0 = arith.constant 0 : i32
    %c0_i32_1 = arith.constant 0 : i32
    return %c0_i32, %c0_i32_0 : i32, i32
  }
  func.func @transform_9(%arg0: i32) -> (i32, i32) {
    %c0_i32 = arith.constant 0 : i32
    %c0_i32_0 = arith.constant 0 : i32
    return %arg0, %c0_i32 : i32, i32
  }
}

</mosaic_0001>

<bundles_post_ra>
// kernel: tpu_custom_call.1
= control target key start
LH: loop header
LB: loop body
LE: loop exit
PB: predicated region body
PF: predicated region fallthrough
CT: control target
= control target key end

     0   :  { %14 = vsyncpa [#allocation3], 0  ;;  %s1763_s0 = inlined_call_operand.hbm [shape: f32[16,16], index: 0, kind: input, shape index: {}]   ;;  %s1764_s1 = inlined_call_operand.hbm [shape: bf16[16,256], index: 1, kind: input, shape index: {}]   ;;  %s1765_s2 = inlined_call_operand.hbm [shape: f32[1,256], index: 2, kind: input, shape index: {}]   ;;  %s1766_s3 = inlined_call_operand.hbm [shape: bf16[256,256], index: 3, kind: input, shape index: {}]   ;;  %s1767_s4 = inlined_call_operand.vmem [shape: f32[1,256], index: 4, kind: input, shape index: {}]   ;;  %s1768_s5 = inlined_call_operand.hbm [shape: bf16[256,256], index: 5, kind: input, shape index: {}]   ;;  %s1769_s6 = inlined_call_operand.vmem [shape: f32[1,256], index: 6, kind: input, shape index: {}]   ;;  %s1770_s7 = inlined_call_operand.hbm [shape: bf16[256,128], index: 7, kind: input, shape index: {}]   ;;  %s1771_s8 = inlined_call_operand.vmem [shape: f32[1,128], index: 8, kind: input, shape index: {}]   ;;  %s1772_s9 = inlined_call_operand.hbm [shape: f32[16,128], index: 9, kind: output, shape index: {}]  }
   0x1   :  { %15 = vsyncpa [#allocation6], 0 }
   0x2   :  { %16 = vsyncpa [#allocation9], 0 }
   0x3   :  { %17 = vsyncpa [#allocation12], 0 }
   0x4   :  { %18 = vsyncpa [#allocation4], 0  ;;  %s36_s11 = sshll.u32 %s1764_s1, 4  ;;  %s1653_s12 = smov [#allocation5]   ;;  %s37_s11 = int_to_ptr.hbm [resolvable:$true] %s36_s11 }
   0x5   :  { %s38_s13 = sshll.u32 %s1653_s12, 4  ;;  %s60_s16 = sshll.u32 %s1766_s3, 4  ;;  %s39_s13 = int_to_ptr.vmem [resolvable:$true] %s38_s13  ;;  %s61_s16 = int_to_ptr.hbm [resolvable:$true] %s60_s16 }
   0x6   :  { %s1654_s17 = smov 128   ;;  %s1655_s18 = smov 8  }
   0x7   :  { %44 = dma.hbm_to_vmem [thread:$0]  %s37_s11, 256, %s39_s13, [#allocation6], %s1654_s17, %s1654_s17, %s1655_s18  }
   0x8   :  { %s1656_s19 = smov [#allocation8]   ;;  %s23_s1 = sshll.u32 %s1763_s0, 4  ;;  %s24_s1 = int_to_ptr.hbm [resolvable:$true] %s23_s1 }
   0x9   :  { %s62_s20 = sshll.u32 %s1656_s19, 4  ;;  %s50_s24 = sshll.u32 %s1765_s2, 4  ;;  %s63_s20 = int_to_ptr.vmem [resolvable:$true] %s62_s20  ;;  %s51_s24 = int_to_ptr.hbm [resolvable:$true] %s50_s24 }
   0xa   :  { %68 = dma.hbm_to_vmem [thread:$0]  %s61_s16, 4096, %s63_s20, [#allocation9], %s1654_s17, %s1654_s17, %s1655_s18  }
   0xb   :  { %s1657_s25 = smov [#allocation2]   ;;  %s1658_s27 = smov [#allocation7]  }
   0xc   :  { %s25_s26 = sshll.u32 %s1657_s25, 4  ;;  %s52_s0 = sshll.u32 %s1658_s27, 4  ;;  %s26_s26 = int_to_ptr.vmem [resolvable:$true] %s25_s26  ;;  %s53_s0 = int_to_ptr.vmem [resolvable:$true] %s52_s0 }
   0xd   :  { %31 = dma.hbm_to_vmem [thread:$0]  %s24_s1, 256, %s26_s26, [#allocation3], %s1654_s17, %s1654_s17, %s1655_s18  }
   0xe   :  { %s75_s30 = sshll.u32 %s1768_s5, 4  ;;  %s90_s2 = sshll.u32 %s1770_s7, 4  ;;  %s76_s30 = int_to_ptr.hbm [resolvable:$true] %s75_s30  ;;  %s91_s2 = int_to_ptr.hbm [resolvable:$true] %s90_s2 }
   0xf   :  { %55 = dma.hbm_to_vmem [thread:$0]  %s51_s24, 32, %s53_s0, [#allocation6]  }
  0x10   :  { %s1659_s12 = smov [#allocation10]   ;;  %s1660_s14 = smov [#allocation11]  }
  0x11   :  { %s77_s13 = sshll.u32 %s1659_s12, 4  ;;  %s92_s15 = sshll.u32 %s1660_s14, 4  ;;  %s78_s13 = int_to_ptr.vmem [resolvable:$true] %s77_s13  ;;  %s93_s15 = int_to_ptr.vmem [resolvable:$true] %s92_s15 }
  0x12   :  { %83 = dma.hbm_to_vmem [thread:$0]  %s76_s30, 4096, %s78_s13, [#allocation9], %s1654_s17, %s1654_s17, %s1655_s18  }
  0x13   :  { %s1661_s16 = smov 64   ;;  %s1662_s5 = smov 4  }
  0x14   :  { %98 = dma.hbm_to_vmem [thread:$0]  %s91_s2, 2048, %s93_s15, [#allocation12], %s1661_s16, %s1661_s16, %s1662_s5  }
  0x15   :  { %1643 = dma.done.wait [#allocation3], 256  }
  0x16   :  { %1644 = vsyncadd [#allocation3], 4294967040 }
  0x17   :  { %1645 = dma.done.wait [#allocation6], 288  }
  0x18   :  { %1646 = vsyncadd [#allocation6], 4294967008 }
  0x19   :  { %1647 = dma.done.wait [#allocation9], 8192  }
  0x1a   :  { %1648 = vsyncadd [#allocation9], 4294959104 }
  0x1b   :  { %1649 = dma.done.wait [#allocation12], 2048  }
  0x1c   :  { %1650 = vsyncadd [#allocation12], 4294965248  ;;  %v1021_v0 = vld [vmem:[#allocation5] sm:$0xf]  ;;  %v1350_v1 = vld [vmem:[#allocation5 + $0x4] sm:$0xf0] }
  0x1d   :  { %v1349_v2 = vld [vmem:[#allocation5 + $0x4] sm:$0xf]  ;;  %v1022_v3 = vor.u32 %v1350_v1, %v1021_v0  ;;  %v1023_v4 = vld [vmem:[#allocation5 + $0x8] sm:$0xf0]  ;;  %v126_v5 = vld [vmem:[#allocation2] sm:$0xff]  ;;  %vm155_vm2 = vcmask 130048  }
  0x1e   :  { %v127_v6 = vld [vmem:[#allocation2 + $0x8] sm:$0xff]  ;;  %v1026_v7 = vor.u32 %v1349_v2, %v1023_v4  ;;  %vm128_vm0 = vcmp.ne.f32.partialorder %v126_v5, %v126_v5  ;;  %v1087_v13 = vld [vmem:[#allocation8 + $0x70] sm:$0xf]  ;;  %v1366_v14 = vld [vmem:[#allocation8 + $0x74] sm:$0xf0]  ;;  %s1001_s23 = sshll.u32 %s1772_s9, 4  ;;  %s1002_s23 = int_to_ptr.hbm [resolvable:$true] %s1001_s23 }
  0x1f   :  { %vm129_vm1 = vcmp.ne.f32.partialorder %v127_v6, %v127_v6  ;;  %166 = vmatpush.bf16.msra.mxu0 %v1022_v3  ;;  %v130_v8 = vsel %vm128_vm0, 0.0, %v126_v5  ;;  %v1151_v15 = vld [vmem:[#allocation8 + $0xf0] sm:$0xf]  ;;  %v1088_v16 = vor.u32 %v1366_v14, %v1087_v13  ;;  %v1382_v17 = vld [vmem:[#allocation8 + $0xf4] sm:$0xf0] }
  0x20   :  { %v131_v9 = vsel %vm129_vm1, 0.0, %v127_v6  ;;  %180 = vmatpush.bf16.msra.mxu1 %v1026_v7  ;;  %v1017_v10 = vclamps-f32 %v130_v8, 3.4028235e+38  ;;  %v1365_v18 = vld [vmem:[#allocation8 + $0x74] sm:$0xf]  ;;  %v1152_v20 = vor.u32 %v1382_v17, %v1151_v15 }
  0x21   :  { %v1018_v11 = vclamps-f32 %v131_v9, 3.4028235e+38  ;;  %v1089_v19 = vld [vmem:[#allocation8 + $0x78] sm:$0xf0]  ;;  %v1381_v22 = vld [vmem:[#allocation8 + $0xf4] sm:$0xf]  ;;  %423 = vmatpush.bf16.msra.mxu2 %v1088_v16 }
  0x22   :  { %v1092_v21 = vor.u32 %v1365_v18, %v1089_v19  ;;  %v1153_v23 = vld [vmem:[#allocation8 + $0xf8] sm:$0xf0]  ;;  %437 = vmatpush.bf16.msra.mxu3 %v1152_v20  ;;  %v1079_v25 = vld [vmem:[#allocation8 + $0x60] sm:$0xf]  ;;  %v1364_v26 = vld [vmem:[#allocation8 + $0x64] sm:$0xf0] }
  0x23   :  { %v136_v12 = vpack.c.bf16 %v1018_v11, %v1017_v10  ;;  %v1156_v24 = vor.u32 %v1381_v22, %v1153_v23  ;;  %v1143_v27 = vld [vmem:[#allocation8 + $0xe0] sm:$0xf]  ;;  %v1080_v28 = vor.u32 %v1364_v26, %v1079_v25  ;;  %v1380_v29 = vld [vmem:[#allocation8 + $0xe4] sm:$0xf0]  ;;  %v1363_v30 = vld [vmem:[#allocation8 + $0x64] sm:$0xf] }
  0x24   :  { %451 = vmatpush.bf16.msrb.mxu0 %v1092_v21  ;;  %v1081_v31 = vld [vmem:[#allocation8 + $0x68] sm:$0xf0]  ;;  %v1144_v32 = vor.u32 %v1380_v29, %v1143_v27  ;;  %v1379_v34 = vld [vmem:[#allocation8 + $0xe4] sm:$0xf]  ;;  %v1071_v37 = vld [vmem:[#allocation8 + $0x50] sm:$0xf] }
  0x25   :  { %1027 = vmatmul.msk.bf16.vlgmr.msra.gmra.mxu0 %vm155_vm2, %v136_v12  ;;  %1028 = vmatmul.msk.bf16.vlgmr.msra.gmra.mxu1 %vm155_vm2, %v136_v12  ;;  %v1084_v33 = vor.u32 %v1363_v30, %v1081_v31  ;;  %v1145_v35 = vld [vmem:[#allocation8 + $0xe8] sm:$0xf0]  ;;  %v1362_v38 = vld [vmem:[#allocation8 + $0x54] sm:$0xf0]  ;;  %v1135_v39 = vld [vmem:[#allocation8 + $0xd0] sm:$0xf] }
  0x26   :  { %465 = vmatpush.bf16.msrb.mxu1 %v1156_v24  ;;  %424 = vmatpush.bf16.msra.mxu2 %v1080_v28  ;;  %v1148_v36 = vor.u32 %v1379_v34, %v1145_v35  ;;  %v1072_v40 = vor.u32 %v1362_v38, %v1071_v37  ;;  %v1378_v41 = vld [vmem:[#allocation8 + $0xd4] sm:$0xf0]  ;;  %v1361_v42 = vld [vmem:[#allocation8 + $0x54] sm:$0xf]  ;;  %v1073_v43 = vld [vmem:[#allocation8 + $0x58] sm:$0xf0] }
  0x27   :  { %438 = vmatpush.bf16.msra.mxu3 %v1144_v32  ;;  %v1136_v44 = vor.u32 %v1378_v41, %v1135_v39  ;;  %v1076_v45 = vor.u32 %v1361_v42, %v1073_v43  ;;  %v1377_v46 = vld [vmem:[#allocation8 + $0xd4] sm:$0xf]  ;;  %v1137_v47 = vld [vmem:[#allocation8 + $0xd8] sm:$0xf0]  ;;  %v1063_v49 = vld [vmem:[#allocation8 + $0x40] sm:$0xf] }
  0x28   :  { %452 = vmatpush.bf16.msrb.mxu0 %v1084_v33  ;;  %v1140_v48 = vor.u32 %v1377_v46, %v1137_v47  ;;  %v1360_v50 = vld [vmem:[#allocation8 + $0x44] sm:$0xf0]  ;;  %v1127_v51 = vld [vmem:[#allocation8 + $0xc0] sm:$0xf]  ;;  %v1359_v54 = vld [vmem:[#allocation8 + $0x44] sm:$0xf] }
  0x29   :  { %v1064_v52 = vor.u32 %v1360_v50, %v1063_v49  ;;  %v1376_v53 = vld [vmem:[#allocation8 + $0xc4] sm:$0xf0]  ;;  %v1065_v55 = vld [vmem:[#allocation8 + $0x48] sm:$0xf0]  ;;  %v1375_v58 = vld [vmem:[#allocation8 + $0xc4] sm:$0xf] }
  0x2a   :  { %466 = vmatpush.bf16.msrb.mxu1 %v1148_v36  ;;  %425 = vmatpush.bf16.msra.mxu2 %v1072_v40  ;;  %v1128_v56 = vor.u32 %v1376_v53, %v1127_v51  ;;  %v1068_v57 = vor.u32 %v1359_v54, %v1065_v55  ;;  %v1129_v59 = vld [vmem:[#allocation8 + $0xc8] sm:$0xf0]  ;;  %v1055_v61 = vld [vmem:[#allocation8 + $0x30] sm:$0xf]  ;;  %v1358_v62 = vld [vmem:[#allocation8 + $0x34] sm:$0xf0] }
  0x2b   :  { %439 = vmatpush.bf16.msra.mxu3 %v1136_v44  ;;  %v1132_v60 = vor.u32 %v1375_v58, %v1129_v59  ;;  %v1119_v63 = vld [vmem:[#allocation8 + $0xb0] sm:$0xf]  ;;  %v1056_v0 = vor.u32 %v1358_v62, %v1055_v61  ;;  %v1374_v1 = vld [vmem:[#allocation8 + $0xb4] sm:$0xf0]  ;;  %v1357_v2 = vld [vmem:[#allocation8 + $0x34] sm:$0xf] }
  0x2c   :  { %453 = vmatpush.bf16.msrb.mxu0 %v1076_v45  ;;  %v1057_v3 = vld [vmem:[#allocation8 + $0x38] sm:$0xf0]  ;;  %v1120_v4 = vor.u32 %v1374_v1, %v1119_v63  ;;  %v1373_v6 = vld [vmem:[#allocation8 + $0xb4] sm:$0xf]  ;;  %v1047_v8 = vld [vmem:[#allocation8 + $0x20] sm:$0xf] }
  0x2d   :  { %v1060_v5 = vor.u32 %v1357_v2, %v1057_v3  ;;  %v1121_v7 = vld [vmem:[#allocation8 + $0xb8] sm:$0xf0]  ;;  %v1356_v10 = vld [vmem:[#allocation8 + $0x24] sm:$0xf0]  ;;  %v1111_v11 = vld [vmem:[#allocation8 + $0xa0] sm:$0xf] }
  0x2e   :  { %467 = vmatpush.bf16.msrb.mxu1 %v1140_v48  ;;  %426 = vmatpush.bf16.msra.mxu2 %v1064_v52  ;;  %v1124_v9 = vor.u32 %v1373_v6, %v1121_v7  ;;  %v1372_v12 = vld [vmem:[#allocation8 + $0xa4] sm:$0xf0]  ;;  %v1048_v13 = vor.u32 %v1356_v10, %v1047_v8  ;;  %v1355_v14 = vld [vmem:[#allocation8 + $0x24] sm:$0xf]  ;;  %v1049_v15 = vld [vmem:[#allocation8 + $0x28] sm:$0xf0] }
  0x2f   :  { %440 = vmatpush.bf16.msra.mxu3 %v1128_v56  ;;  %v1371_v16 = vld [vmem:[#allocation8 + $0xa4] sm:$0xf]  ;;  %v1112_v17 = vor.u32 %v1372_v12, %v1111_v11  ;;  %v1052_v18 = vor.u32 %v1355_v14, %v1049_v15  ;;  %v1113_v19 = vld [vmem:[#allocation8 + $0xa8] sm:$0xf0]  ;;  %v1039_v20 = vld [vmem:[#allocation8 + $0x10] sm:$0xf] }
  0x30   :  { %454 = vmatpush.bf16.msrb.mxu0 %v1068_v57  ;;  %v1354_v21 = vld [vmem:[#allocation8 + $0x14] sm:$0xf0]  ;;  %v1116_v22 = vor.u32 %v1371_v16, %v1113_v19  ;;  %v1103_v23 = vld [vmem:[#allocation8 + $0x90] sm:$0xf]  ;;  %v1353_v25 = vld [vmem:[#allocation8 + $0x14] sm:$0xf] }
  0x31   :  { %v1370_v24 = vld [vmem:[#allocation8 + $0x94] sm:$0xf0]  ;;  %v1041_v26 = vld [vmem:[#allocation8 + $0x18] sm:$0xf0]  ;;  %v1369_v27 = vld [vmem:[#allocation8 + $0x94] sm:$0xf]  ;;  %v1040_v30 = vor.u32 %v1354_v21, %v1039_v20 }
  0x32   :  { %468 = vmatpush.bf16.msrb.mxu1 %v1132_v60  ;;  %427 = vmatpush.bf16.msra.mxu2 %v1056_v0  ;;  %v1105_v28 = vld [vmem:[#allocation8 + $0x98] sm:$0xf0]  ;;  %v1104_v31 = vor.u32 %v1370_v24, %v1103_v23  ;;  %v1044_v32 = vor.u32 %v1353_v25, %v1041_v26  ;;  %v1031_v33 = vld [vmem:[#allocation8] sm:$0xf]  ;;  %v1352_v34 = vld [vmem:[#allocation8 + $0x4] sm:$0xf0] }
  0x33   :  { %441 = vmatpush.bf16.msra.mxu3 %v1120_v4  ;;  %v139_v29 = vld [vmem:[#allocation7] sm:$0x3]  ;;  %v1095_v35 = vld [vmem:[#allocation8 + $0x80] sm:$0xf]  ;;  %v1108_v36 = vor.u32 %v1369_v27, %v1105_v28  ;;  %v1368_v37 = vld [vmem:[#allocation8 + $0x84] sm:$0xf0]  ;;  %v1032_v44 = vor.u32 %v1352_v34, %v1031_v33 }
  0x34   :  { %455 = vmatpush.bf16.msrb.mxu0 %v1060_v5  ;;  %v1351_v38 = vld [vmem:[#allocation8 + $0x4] sm:$0xf]  ;;  %v1033_v39 = vld [vmem:[#allocation8 + $0x8] sm:$0xf0]  ;;  %v141_v42 = vperm.slane %v139_v29, 0  ;;  %v142_v43 = vperm.slane %v139_v29, 1  ;;  %v1096_v45 = vor.u32 %v1368_v37, %v1095_v35 }
  0x35   :  { %v1367_v40 = vld [vmem:[#allocation8 + $0x84] sm:$0xf]  ;;  %v1097_v41 = vld [vmem:[#allocation8 + $0x88] sm:$0xf0]  ;;  %v1036_v46 = vor.u32 %v1351_v38, %v1033_v39  ;;  %v1281_v34 = vld [vmem:[#allocation10 + $0xf8] sm:$0xf0] }
  0x36   :  { %469 = vmatpush.bf16.msrb.mxu1 %v1124_v9  ;;  %428 = vmatpush.bf16.msra.mxu2 %v1048_v13  ;;  %v1100_v47 = vor.u32 %v1367_v40, %v1097_v41  ;;  %v1412_v37 = vld [vmem:[#allocation10 + $0xe4] sm:$0xf0]  ;;  %v1411_v38 = vld [vmem:[#allocation10 + $0xe4] sm:$0xf]  ;;  %v1273_v40 = vld [vmem:[#allocation10 + $0xe8] sm:$0xf0] }
  0x37   :  { %442 = vmatpush.bf16.msra.mxu3 %v1112_v17  ;;  %v1276_v41 = vor.u32 %v1411_v38, %v1273_v40  ;;  %v1233_v38 = vld [vmem:[#allocation10 + $0x98] sm:$0xf0]  ;;  %v1388_v40 = vld [vmem:[#allocation10 + $0x24] sm:$0xf0] }
  0x38   :  { %456 = vmatpush.bf16.msrb.mxu0 %v1052_v18 }
  0x3a   :  { %470 = vmatpush.bf16.msrb.mxu1 %v1116_v22  ;;  %429 = vmatpush.bf16.msra.mxu2 %v1040_v30  ;;  %v1279_v30 = vld [vmem:[#allocation10 + $0xf0] sm:$0xf] }
  0x3b   :  { %443 = vmatpush.bf16.msra.mxu3 %v1104_v31  ;;  %v1414_v31 = vld [vmem:[#allocation10 + $0xf4] sm:$0xf0] }
  0x3c   :  { %457 = vmatpush.bf16.msrb.mxu0 %v1044_v32  ;;  %v1413_v32 = vld [vmem:[#allocation10 + $0xf4] sm:$0xf]  ;;  %v1280_v33 = vor.u32 %v1414_v31, %v1279_v30 }
  0x3d   :  { %v1284_v35 = vor.u32 %v1413_v32, %v1281_v34  ;;  %v1185_v32 = vld [vmem:[#allocation10 + $0x38] sm:$0xf0]  ;;  %v1231_v34 = vld [vmem:[#allocation10 + $0x90] sm:$0xf] }
  0x3e   :  { %471 = vmatpush.bf16.msrb.mxu1 %v1108_v36  ;;  %430 = vmatpush.bf16.msra.mxu2 %v1032_v44  ;;  %v1271_v36 = vld [vmem:[#allocation10 + $0xe0] sm:$0xf]  ;;  %v1397_v44 = vld [vmem:[#allocation10 + $0x74] sm:$0xf] }
  0x3f   :  { %444 = vmatpush.bf16.msra.mxu3 %v1096_v45  ;;  %v1272_v39 = vor.u32 %v1412_v37, %v1271_v36  ;;  %v1401_v36 = vld [vmem:[#allocation10 + $0x94] sm:$0xf] }
  0x40   :  { %458 = vmatpush.bf16.msrb.mxu0 %v1036_v46  ;;  %v1217_v46 = vld [vmem:[#allocation10 + $0x78] sm:$0xf0] }
  0x42   :  { %472 = vmatpush.bf16.msrb.mxu1 %v1100_v47  ;;  %v1220_v47 = vor.u32 %v1397_v44, %v1217_v46  ;;  %v1177_v44 = vld [vmem:[#allocation10 + $0x28] sm:$0xf0] }
  0x43   :  { %729 = vmatpush.bf16.msrb.mxu3 %v1280_v33 }
  0x44   :  { %743 = vmatpush.bf16.msra.mxu0 %v1220_v47 }
  0x46   :  { %757 = vmatpush.bf16.msra.mxu1 %v1284_v35  ;;  %v1402_v35 = vld [vmem:[#allocation10 + $0x94] sm:$0xf0] }
  0x47   :  { %730 = vmatpush.bf16.msrb.mxu3 %v1272_v39  ;;  %v1232_v37 = vor.u32 %v1402_v35, %v1231_v34  ;;  %v1175_v39 = vld [vmem:[#allocation10 + $0x20] sm:$0xf] }
  0x4a   :  { %758 = vmatpush.bf16.msra.mxu1 %v1276_v41  ;;  %v1236_v41 = vor.u32 %v1401_v36, %v1233_v38 }
  0xa2   :  { %v168_v48 = vpop.f32.mrf.mxu0  ;;  %v182_v49 = vpop.f32.mrf.mxu1 }
  0xa3   :  { %v169_v50 = vadd.f32 %v168_v48, %v141_v42  ;;  %v183_v51 = vadd.f32 %v182_v49, %v142_v43  ;;  %v1263_v48 = vld [vmem:[#allocation10 + $0xd0] sm:$0xf]  ;;  %v1410_v49 = vld [vmem:[#allocation10 + $0xd4] sm:$0xf0] }
  0xa5   :  { %v187_v52 = vmul.f32 %v169_v50, %v169_v50  ;;  %v188_v53 = vmul.f32 %v183_v51, %v183_v51 }
  0xa7   :  { %v191_v54 = vmul.f32 %v187_v52, %v169_v50  ;;  %v192_v55 = vmul.f32 %v188_v53, %v183_v51  ;;  %v1265_v52 = vld [vmem:[#allocation10 + $0xd8] sm:$0xf0] }
  0xa9   :  { %v195_v56 = vmul.f32 0.044715, %v191_v54  ;;  %v196_v57 = vmul.f32 0.044715, %v192_v55  ;;  %v1207_v54 = vld [vmem:[#allocation10 + $0x60] sm:$0xf] }
  0xaa   :  { %v170_v58 = vpop.f32.mrf.mxu0  ;;  %v184_v59 = vpop.f32.mrf.mxu1  ;;  %v1396_v55 = vld [vmem:[#allocation10 + $0x64] sm:$0xf0] }
  0xab   :  { %v199_v60 = vadd.f32 %v195_v56, %v169_v50  ;;  %v200_v61 = vadd.f32 %v196_v57, %v183_v51  ;;  %v171_v62 = vadd.f32 %v170_v58, %v141_v42  ;;  %v185_v63 = vadd.f32 %v184_v59, %v142_v43  ;;  %v1215_v42 = vld [vmem:[#allocation10 + $0x70] sm:$0xf]  ;;  %v1398_v43 = vld [vmem:[#allocation10 + $0x74] sm:$0xf0]  ;;  %v1395_v56 = vld [vmem:[#allocation10 + $0x64] sm:$0xf] }
  0xac   :  { %v1216_v45 = vor.u32 %v1398_v43, %v1215_v42  ;;  %v1208_v57 = vor.u32 %v1396_v55, %v1207_v54  ;;  %v1209_v58 = vld [vmem:[#allocation10 + $0x68] sm:$0xf0]  ;;  %v1176_v42 = vor.u32 %v1388_v40, %v1175_v39  ;;  %v1387_v43 = vld [vmem:[#allocation10 + $0x24] sm:$0xf]  ;;  %v1167_v55 = vld [vmem:[#allocation10 + $0x10] sm:$0xf] }
  0xad   :  { %v189_v0 = vmul.f32 %v171_v62, %v171_v62  ;;  %v190_v1 = vmul.f32 %v185_v63, %v185_v63  ;;  %v203_v2 = vmul.f32 0.7978846, %v199_v60  ;;  %v204_v3 = vmul.f32 0.7978846, %v200_v61  ;;  %v1255_v60 = vld [vmem:[#allocation10 + $0xc0] sm:$0xf] }
  0xae   :  { %715 = vmatpush.bf16.msrb.mxu2 %v1216_v45  ;;  %v1212_v59 = vor.u32 %v1395_v56, %v1209_v58  ;;  %v1408_v61 = vld [vmem:[#allocation10 + $0xc4] sm:$0xf0]  ;;  %v1223_v45 = vld [vmem:[#allocation10 + $0x80] sm:$0xf]  ;;  %v1180_v47 = vor.u32 %v1387_v43, %v1177_v44  ;;  %v1386_v56 = vld [vmem:[#allocation10 + $0x14] sm:$0xf0] }
  0xaf   :  { %v193_v4 = vmul.f32 %v189_v0, %v171_v62  ;;  %v194_v5 = vmul.f32 %v190_v1, %v185_v63  ;;  %1443 = vtanh.f32 %v203_v2  ;;  %v1257_v0 = vld [vmem:[#allocation10 + $0xc8] sm:$0xf0]  ;;  %v1199_v2 = vld [vmem:[#allocation10 + $0x50] sm:$0xf]  ;;  %v1168_v58 = vor.u32 %v1386_v56, %v1167_v55  ;;  %v1430_v55 = vld [vmem:[#allocation11 + $0x78] sm:$0xff] }
  0xb0   :  { %1445 = vtanh.f32 %v204_v3  ;;  %744 = vmatpush.bf16.msra.mxu0 %v1212_v59  ;;  %v1394_v3 = vld [vmem:[#allocation10 + $0x54] sm:$0xf0]  ;;  %v1169_v59 = vld [vmem:[#allocation10 + $0x18] sm:$0xf0]  ;;  %v1429_v56 = vld [vmem:[#allocation11 + $0x70] sm:$0xff] }
  0xb1   :  { %v197_v6 = vmul.f32 0.044715, %v193_v4  ;;  %v198_v7 = vmul.f32 0.044715, %v194_v5  ;;  %v1393_v4 = vld [vmem:[#allocation10 + $0x54] sm:$0xf]  ;;  %v1200_v5 = vor.u32 %v1394_v3, %v1199_v2 }
  0xb2   :  { %716 = vmatpush.bf16.msrb.mxu2 %v1208_v57  ;;  %v1385_v57 = vld [vmem:[#allocation10 + $0x14] sm:$0xf]  ;;  %v1384_v2 = vld [vmem:[#allocation10 + $0x4] sm:$0xf0]  ;;  %v1383_v3 = vld [vmem:[#allocation10 + $0x4] sm:$0xf] }
  0xb3   :  { %v201_v8 = vadd.f32 %v197_v6, %v171_v62  ;;  %v202_v9 = vadd.f32 %v198_v7, %v185_v63  ;;  %v1201_v6 = vld [vmem:[#allocation10 + $0x58] sm:$0xf0] }
  0xb4   :  { %v1204_v7 = vor.u32 %v1393_v4, %v1201_v6 }
  0xb5   :  { %v205_v10 = vmul.f32 0.7978846, %v201_v8  ;;  %v206_v11 = vmul.f32 0.7978846, %v202_v9  ;;  %v1444_v12 = vpop.eup %1443  ;;  %v1247_v8 = vld [vmem:[#allocation10 + $0xb0] sm:$0xf] }
  0xb6   :  { %v1446_v13 = vpop.eup %1445  ;;  %v211_v14 = vadd.f32 1.0, %v1444_v12  ;;  %v1406_v9 = vld [vmem:[#allocation10 + $0xb4] sm:$0xf0]  ;;  %717 = vmatpush.bf16.msrb.mxu2 %v1200_v5  ;;  %v1249_v12 = vld [vmem:[#allocation10 + $0xb8] sm:$0xf0]  ;;  %745 = vmatpush.bf16.msra.mxu0 %v1204_v7 }
  0xb7   :  { %1447 = vtanh.f32 %v205_v10  ;;  %v212_v15 = vadd.f32 1.0, %v1446_v13  ;;  %v1405_v10 = vld [vmem:[#allocation10 + $0xb4] sm:$0xf] }
  0xb8   :  { %1449 = vtanh.f32 %v206_v11  ;;  %v215_v19 = vmul.f32 0.5, %v211_v14  ;;  %v1248_v11 = vor.u32 %v1406_v9, %v1247_v8  ;;  %v1252_v13 = vor.u32 %v1405_v10, %v1249_v12  ;;  %v1191_v14 = vld [vmem:[#allocation10 + $0x40] sm:$0xf]  ;;  %v1161_v8 = vld [vmem:[#allocation10 + $0x8] sm:$0xf0] }
  0xb9   :  { %v216_v21 = vmul.f32 0.5, %v212_v15  ;;  %v1392_v15 = vld [vmem:[#allocation10 + $0x44] sm:$0xf0]  ;;  %v1164_v10 = vor.u32 %v1383_v3, %v1161_v8  ;;  %v1423_v8 = vld [vmem:[#allocation11 + $0x40] sm:$0xff] }
  0xba   :  { %v219_v24 = vmul.f32 %v215_v19, %v169_v50  ;;  %v1409_v50 = vld [vmem:[#allocation10 + $0xd4] sm:$0xf]  ;;  %v1193_v19 = vld [vmem:[#allocation10 + $0x48] sm:$0xf0] }
  0xbb   :  { %v220_v26 = vmul.f32 %v216_v21, %v183_v51  ;;  %v1264_v51 = vor.u32 %v1410_v49, %v1263_v48  ;;  %v1268_v53 = vor.u32 %v1409_v50, %v1265_v52  ;;  %v1239_v21 = vld [vmem:[#allocation10 + $0xa0] sm:$0xf]  ;;  %v1400_v48 = vld [vmem:[#allocation10 + $0x84] sm:$0xf0]  ;;  %v1399_v49 = vld [vmem:[#allocation10 + $0x84] sm:$0xf] }
  0xbc   :  { %v1225_v50 = vld [vmem:[#allocation10 + $0x88] sm:$0xf0] }
  0xbd   :  { %v1448_v16 = vpop.eup %1447  ;;  %731 = vmatpush.bf16.msrb.mxu3 %v1264_v51  ;;  %759 = vmatpush.bf16.msra.mxu1 %v1268_v53  ;;  %v1224_v53 = vor.u32 %v1400_v48, %v1223_v45  ;;  %v1228_v54 = vor.u32 %v1399_v49, %v1225_v50 }
  0xbe   :  { %v1450_v17 = vpop.eup %1449  ;;  %v213_v18 = vadd.f32 1.0, %v1448_v16  ;;  %v1391_v16 = vld [vmem:[#allocation10 + $0x44] sm:$0xf] }
  0xbf   :  { %v214_v20 = vadd.f32 1.0, %v1450_v17  ;;  %v1747_v17 = vld [vmem:[%s1767_s4] sm:$0x3] }
  0xc0   :  { %v217_v22 = vmul.f32 0.5, %v213_v18  ;;  %v1192_v18 = vor.u32 %v1392_v15, %v1191_v14  ;;  %v260_v30 = vperm.slane %v1747_v17, 1 }
  0xc1   :  { %v218_v23 = vmul.f32 0.5, %v214_v20  ;;  %v1196_v20 = vor.u32 %v1391_v16, %v1193_v19 }
  0xc2   :  { %v221_v25 = vmul.f32 %v217_v22, %v171_v62  ;;  %v1407_v62 = vld [vmem:[#allocation10 + $0xc4] sm:$0xf]  ;;  %v1404_v22 = vld [vmem:[#allocation10 + $0xa4] sm:$0xf0]  ;;  %718 = vmatpush.bf16.msrb.mxu2 %v1192_v18 }
  0xc3   :  { %v222_v27 = vmul.f32 %v218_v23, %v185_v63  ;;  %v1256_v63 = vor.u32 %v1408_v61, %v1255_v60  ;;  %v1260_v1 = vor.u32 %v1407_v62, %v1257_v0  ;;  %v1403_v23 = vld [vmem:[#allocation10 + $0xa4] sm:$0xf]  ;;  %746 = vmatpush.bf16.msra.mxu0 %v1196_v20  ;;  %v259_v61 = vperm.slane %v1747_v17, 0 }
  0xc4   :  { %v223_v28 = vpack.c.bf16 %v221_v25, %v219_v24  ;;  %v1240_v24 = vor.u32 %v1404_v22, %v1239_v21  ;;  %v1241_v25 = vld [vmem:[#allocation10 + $0xa8] sm:$0xf0]  ;;  %v1172_v62 = vor.u32 %v1385_v57, %v1169_v59  ;;  %v1422_v57 = vld [vmem:[#allocation11 + $0x38] sm:$0xff]  ;;  %v1421_v59 = vld [vmem:[#allocation11 + $0x30] sm:$0xff] }
  0xc5   :  { %v224_v29 = vpack.c.bf16 %v222_v27, %v220_v26  ;;  %732 = vmatpush.bf16.msrb.mxu3 %v1256_v63  ;;  %760 = vmatpush.bf16.msra.mxu1 %v1260_v1  ;;  %v1244_v26 = vor.u32 %v1403_v23, %v1241_v25  ;;  %v1183_v27 = vld [vmem:[#allocation10 + $0x30] sm:$0xf]  ;;  %v1159_v1 = vld [vmem:[#allocation10] sm:$0xf] }
  0xc6   :  { %431 = vmatmul.bf16.vlgmr.msra.gmra.mxu2 %v223_v28  ;;  %459 = vmatmul.bf16.vlgmr.msrb.gmra.mxu0 %v223_v28  ;;  %v1390_v28 = vld [vmem:[#allocation10 + $0x34] sm:$0xf0]  ;;  %v1160_v7 = vor.u32 %v1384_v2, %v1159_v1  ;;  %v1425_v1 = vld [vmem:[#allocation11 + $0x50] sm:$0xff] }
  0xc7   :  { %445 = vmatmul.bf16.vlgmr.msra.gmra.mxu3 %v224_v29  ;;  %473 = vmatmul.bf16.vlgmr.msrb.gmra.mxu1 %v224_v29  ;;  %v1389_v29 = vld [vmem:[#allocation10 + $0x34] sm:$0xf]  ;;  %v1184_v31 = vor.u32 %v1390_v28, %v1183_v27  ;;  %v1418_v2 = vld [vmem:[#allocation11 + $0x18] sm:$0xff] }
  0xc8   :  { %v1188_v33 = vor.u32 %v1389_v29, %v1185_v32 }
  0xc9   :  { %733 = vmatpush.bf16.msrb.mxu3 %v1248_v11  ;;  %761 = vmatpush.bf16.msra.mxu1 %v1252_v13 }
  0xca   :  { %719 = vmatpush.bf16.msrb.mxu2 %v1184_v31  ;;  %747 = vmatpush.bf16.msra.mxu0 %v1188_v33 }
  0xcd   :  { %734 = vmatpush.bf16.msrb.mxu3 %v1240_v24  ;;  %762 = vmatpush.bf16.msra.mxu1 %v1244_v26 }
  0xce   :  { %720 = vmatpush.bf16.msrb.mxu2 %v1176_v42  ;;  %748 = vmatpush.bf16.msra.mxu0 %v1180_v47 }
  0xd1   :  { %735 = vmatpush.bf16.msrb.mxu3 %v1232_v37  ;;  %763 = vmatpush.bf16.msra.mxu1 %v1236_v41 }
  0xd2   :  { %721 = vmatpush.bf16.msrb.mxu2 %v1168_v58  ;;  %749 = vmatpush.bf16.msra.mxu0 %v1172_v62  ;;  %v1428_v58 = vld [vmem:[#allocation11 + $0x68] sm:$0xff]  ;;  %v1426_v62 = vld [vmem:[#allocation11 + $0x58] sm:$0xff] }
  0xd5   :  { %736 = vmatpush.bf16.msrb.mxu3 %v1224_v53  ;;  %764 = vmatpush.bf16.msra.mxu1 %v1228_v54 }
  0xd6   :  { %722 = vmatpush.bf16.msrb.mxu2 %v1160_v7  ;;  %750 = vmatpush.bf16.msra.mxu0 %v1164_v10  ;;  %v1416_v10 = vld [vmem:[#allocation11 + $0x8] sm:$0xff] }
  0xd9   :  { %955 = vmatpush.bf16.msra.mxu3 %v1430_v55 }
  0xda   :  { %941 = vmatpush.bf16.msra.mxu2 %v1422_v57 }
  0xdd   :  { %956 = vmatpush.bf16.msra.mxu3 %v1429_v56 }
  0xde   :  { %942 = vmatpush.bf16.msra.mxu2 %v1421_v59 }
  0xe1   :  { %957 = vmatpush.bf16.msra.mxu3 %v1428_v58 }
 0x143   :  { %v460_v46 = vpop.f32.mrf.mxu0 }
 0x144   :  { %v461_v51 = vadd.f32 %v460_v46, %v260_v30  ;;  %v474_v52 = vpop.f32.mrf.mxu1 }
 0x146   :  { %v475_v60 = vadd.f32 %v474_v52, %v461_v51 }
 0x148   :  { %v480_v63 = vmul.f32 %v475_v60, %v475_v60 }
 0x149   :  { %v432_v0 = vpop.f32.mrf.mxu2 }
 0x14a   :  { %v484_v4 = vmul.f32 %v480_v63, %v475_v60  ;;  %v433_v5 = vadd.f32 %v432_v0, %v259_v61  ;;  %v446_v6 = vpop.f32.mrf.mxu3  ;;  %v1419_v63 = vld [vmem:[#allocation11 + $0x20] sm:$0xff]  ;;  %v549_v0 = vld [vmem:[%s1769_s6] sm:$0x3] }
 0x14b   :  { %v462_v9 = vpop.f32.mrf.mxu0  ;;  %v552_v3 = vperm.slane %v549_v0, 1 }
 0x14c   :  { %v488_v11 = vmul.f32 0.044715, %v484_v4  ;;  %v447_v12 = vadd.f32 %v446_v6, %v433_v5  ;;  %v463_v13 = vadd.f32 %v462_v9, %v260_v30  ;;  %v476_v14 = vpop.f32.mrf.mxu1  ;;  %v1424_v4 = vld [vmem:[#allocation11 + $0x48] sm:$0xff]  ;;  %v1417_v5 = vld [vmem:[#allocation11 + $0x10] sm:$0xff] }
 0x14e   :  { %v492_v15 = vadd.f32 %v488_v11, %v475_v60  ;;  %v479_v16 = vmul.f32 %v447_v12, %v447_v12  ;;  %v477_v17 = vadd.f32 %v476_v14, %v463_v13 }
 0x150   :  { %v496_v18 = vmul.f32 0.7978846, %v492_v15  ;;  %v483_v19 = vmul.f32 %v479_v16, %v447_v12  ;;  %v482_v20 = vmul.f32 %v477_v17, %v477_v17  ;;  %v1415_v16 = vld [vmem:[#allocation11] sm:$0xff] }
 0x151   :  { %v434_v21 = vpop.f32.mrf.mxu2 }
 0x152   :  { %v487_v22 = vmul.f32 0.044715, %v483_v19  ;;  %v486_v23 = vmul.f32 %v482_v20, %v477_v17  ;;  %v435_v24 = vadd.f32 %v434_v21, %v259_v61  ;;  %v448_v25 = vpop.f32.mrf.mxu3  ;;  %1451 = vtanh.f32 %v496_v18  ;;  %v1420_v61 = vld [vmem:[#allocation11 + $0x28] sm:$0xff] }
 0x153   :  { %943 = vmatpush.bf16.msra.mxu2 %v1420_v61 }
 0x154   :  { %v491_v26 = vadd.f32 %v487_v22, %v447_v12  ;;  %v490_v27 = vmul.f32 0.044715, %v486_v23  ;;  %v449_v28 = vadd.f32 %v448_v25, %v435_v24 }
 0x156   :  { %v495_v29 = vmul.f32 0.7978846, %v491_v26  ;;  %v494_v30 = vadd.f32 %v490_v27, %v477_v17  ;;  %v481_v31 = vmul.f32 %v449_v28, %v449_v28 }
 0x157   :  { %944 = vmatpush.bf16.msra.mxu2 %v1419_v63 }
 0x158   :  { %v498_v32 = vmul.f32 0.7978846, %v494_v30  ;;  %v485_v33 = vmul.f32 %v481_v31, %v449_v28  ;;  %1453 = vtanh.f32 %v495_v29  ;;  %v1452_v34 = vpop.eup %1451 }
 0x159   :  { %v504_v37 = vadd.f32 1.0, %v1452_v34 }
 0x15a   :  { %1455 = vtanh.f32 %v498_v32  ;;  %v489_v35 = vmul.f32 0.044715, %v485_v33 }
 0x15b   :  { %v508_v42 = vmul.f32 0.5, %v504_v37  ;;  %945 = vmatpush.bf16.msra.mxu2 %v1418_v2 }
 0x15c   :  { %v493_v36 = vadd.f32 %v489_v35, %v449_v28 }
 0x15d   :  { %v512_v45 = vmul.f32 %v508_v42, %v475_v60  ;;  %v1427_v60 = vld [vmem:[#allocation11 + $0x60] sm:$0xff] }
 0x15e   :  { %v497_v38 = vmul.f32 0.7978846, %v493_v36  ;;  %v1454_v39 = vpop.eup %1453  ;;  %958 = vmatpush.bf16.msra.mxu3 %v1427_v60 }
 0x15f   :  { %v503_v44 = vadd.f32 1.0, %v1454_v39  ;;  %946 = vmatpush.bf16.msra.mxu2 %v1417_v5 }
 0x160   :  { %v1456_v40 = vpop.eup %1455  ;;  %1457 = vtanh.f32 %v497_v38 }
 0x161   :  { %v506_v41 = vadd.f32 1.0, %v1456_v40  ;;  %v507_v50 = vmul.f32 0.5, %v503_v44 }
 0x162   :  { %959 = vmatpush.bf16.msra.mxu3 %v1426_v62 }
 0x163   :  { %v510_v43 = vmul.f32 0.5, %v506_v41  ;;  %v511_v52 = vmul.f32 %v507_v50, %v447_v12  ;;  %v551_v12 = vperm.slane %v549_v0, 0  ;;  %947 = vmatpush.bf16.msra.mxu2 %v1416_v10  ;;  %v1442_v0 = vld [vmem:[%s1771_s8] ss:$0 sm:$0xff]  ;;  %s1663_s8 = smov [#allocation13]  }
 0x164   :  { %s999_s22 = sshll.u32 %s1663_s8, 4  ;;  %s1000_s22 = int_to_ptr.vmem [resolvable:$true] %s999_s22 }
 0x165   :  { %v514_v46 = vmul.f32 %v510_v43, %v477_v17 }
 0x166   :  { %v1458_v47 = vpop.eup %1457  ;;  %960 = vmatpush.bf16.msra.mxu3 %v1425_v1 }
 0x167   :  { %v516_v48 = vpack.c.bf16 %v514_v46, %v512_v45  ;;  %v505_v49 = vadd.f32 1.0, %v1458_v47  ;;  %948 = vmatpush.bf16.msra.mxu2 %v1415_v16 }
 0x169   :  { %737 = vmatmul.bf16.vlgmr.msrb.gmra.mxu3 %v516_v48  ;;  %765 = vmatmul.bf16.vlgmr.msra.gmra.mxu1 %v516_v48  ;;  %v509_v51 = vmul.f32 0.5, %v505_v49 }
 0x16a   :  { %961 = vmatpush.bf16.msra.mxu3 %v1424_v4 }
 0x16b   :  { %v513_v53 = vmul.f32 %v509_v51, %v449_v28 }
 0x16d   :  { %v515_v54 = vpack.c.bf16 %v513_v53, %v511_v52 }
 0x16e   :  { %962 = vmatpush.bf16.msra.mxu3 %v1423_v8 }
 0x16f   :  { %723 = vmatmul.bf16.vlgmr.msrb.gmra.mxu2 %v515_v54  ;;  %751 = vmatmul.bf16.vlgmr.msra.gmra.mxu0 %v515_v54 }
 0x1e6   :  { %v766_v6 = vpop.f32.mrf.mxu1 }
 0x1ec   :  { %v752_v7 = vpop.f32.mrf.mxu0  ;;  %v738_v14 = vpop.f32.mrf.mxu3 }
 0x1ed   :  { %v753_v9 = vadd.f32 %v752_v7, %v552_v3 }
 0x1ee   :  { %v768_v23 = vpop.f32.mrf.mxu1 }
 0x1ef   :  { %v767_v11 = vadd.f32 %v766_v6, %v753_v9 }
 0x1f1   :  { %v772_v13 = vmul.f32 %v767_v11, %v767_v11 }
 0x1f2   :  { %v724_v15 = vpop.f32.mrf.mxu2 }
 0x1f3   :  { %v776_v17 = vmul.f32 %v772_v13, %v767_v11  ;;  %v725_v18 = vadd.f32 %v724_v15, %v551_v12 }
 0x1f4   :  { %v754_v19 = vpop.f32.mrf.mxu0  ;;  %v740_v34 = vpop.f32.mrf.mxu3 }
 0x1f5   :  { %v780_v20 = vmul.f32 0.044715, %v776_v17  ;;  %v739_v21 = vadd.f32 %v738_v14, %v725_v18  ;;  %v755_v22 = vadd.f32 %v754_v19, %v552_v3 }
 0x1f7   :  { %v784_v24 = vadd.f32 %v780_v20, %v767_v11  ;;  %v771_v25 = vmul.f32 %v739_v21, %v739_v21  ;;  %v769_v26 = vadd.f32 %v768_v23, %v755_v22 }
 0x1f9   :  { %v788_v27 = vmul.f32 0.7978846, %v784_v24  ;;  %v775_v28 = vmul.f32 %v771_v25, %v739_v21  ;;  %v774_v29 = vmul.f32 %v769_v26, %v769_v26 }
 0x1fa   :  { %v726_v30 = vpop.f32.mrf.mxu2 }
 0x1fb   :  { %v779_v31 = vmul.f32 0.044715, %v775_v28  ;;  %v778_v32 = vmul.f32 %v774_v29, %v769_v26  ;;  %v727_v33 = vadd.f32 %v726_v30, %v551_v12  ;;  %1459 = vtanh.f32 %v788_v27 }
 0x1fd   :  { %v783_v35 = vadd.f32 %v779_v31, %v739_v21  ;;  %v782_v36 = vmul.f32 0.044715, %v778_v32  ;;  %v741_v37 = vadd.f32 %v740_v34, %v727_v33 }
 0x1ff   :  { %v787_v38 = vmul.f32 0.7978846, %v783_v35  ;;  %v786_v39 = vadd.f32 %v782_v36, %v769_v26  ;;  %v773_v40 = vmul.f32 %v741_v37, %v741_v37 }
 0x201   :  { %v790_v41 = vmul.f32 0.7978846, %v786_v39  ;;  %v777_v42 = vmul.f32 %v773_v40, %v741_v37  ;;  %1461 = vtanh.f32 %v787_v38  ;;  %v1460_v43 = vpop.eup %1459 }
 0x202   :  { %v796_v46 = vadd.f32 1.0, %v1460_v43 }
 0x203   :  { %1463 = vtanh.f32 %v790_v41  ;;  %v781_v44 = vmul.f32 0.044715, %v777_v42 }
 0x204   :  { %v800_v51 = vmul.f32 0.5, %v796_v46 }
 0x205   :  { %v785_v45 = vadd.f32 %v781_v44, %v741_v37 }
 0x206   :  { %v804_v54 = vmul.f32 %v800_v51, %v767_v11 }
 0x207   :  { %v789_v47 = vmul.f32 0.7978846, %v785_v45  ;;  %v1462_v48 = vpop.eup %1461 }
 0x208   :  { %v795_v53 = vadd.f32 1.0, %v1462_v48 }
 0x209   :  { %v1464_v49 = vpop.eup %1463  ;;  %1465 = vtanh.f32 %v789_v47 }
 0x20a   :  { %v798_v50 = vadd.f32 1.0, %v1464_v49  ;;  %v799_v59 = vmul.f32 0.5, %v795_v53 }
 0x20c   :  { %v802_v52 = vmul.f32 0.5, %v798_v50  ;;  %v803_v61 = vmul.f32 %v799_v59, %v739_v21 }
 0x20e   :  { %v806_v55 = vmul.f32 %v802_v52, %v769_v26 }
 0x20f   :  { %v1466_v56 = vpop.eup %1465 }
 0x210   :  { %v808_v57 = vpack.c.bf16 %v806_v55, %v804_v54  ;;  %v797_v58 = vadd.f32 1.0, %v1466_v56 }
 0x212   :  { %963 = vmatmul.bf16.vlgmr.msra.gmra.mxu3 %v808_v57  ;;  %v801_v60 = vmul.f32 0.5, %v797_v58 }
 0x214   :  { %v805_v62 = vmul.f32 %v801_v60, %v741_v37 }
 0x216   :  { %v807_v63 = vpack.c.bf16 %v805_v62, %v803_v61 }
 0x218   :  { %949 = vmatmul.bf16.vlgmr.msra.gmra.mxu2 %v807_v63 }
 0x295   :  { %v964_v1 = vpop.f32.mrf.mxu3 }
 0x29b   :  { %v950_v2 = vpop.f32.mrf.mxu2 }
 0x29c   :  { %v951_v3 = vadd.f32 %v1442_v0, %v950_v2 }
 0x29d   :  { %v966_v7 = vpop.f32.mrf.mxu3 }
 0x29e   :  { %v965_v4 = vadd.f32 %v964_v1, %v951_v3 }
 0x2a0   :  { %969 = vmax.xlane.f32.xlu0 %v965_v4 }
 0x2a3   :  { %v952_v5 = vpop.f32.mrf.mxu2 }
 0x2a4   :  { %v953_v6 = vadd.f32 %v1442_v0, %v952_v5 }
 0x2a6   :  { %v967_v8 = vadd.f32 %v966_v7, %v953_v6 }
 0x2a8   :  { %971 = vmax.xlane.f32.xlu0 %v967_v8 }
 0x313   :  { %v970_v9 = vpop.xlane.xlu0 %969 }
 0x314   :  { %v973_v10 = vsub.f32 %v965_v4, %v970_v9 }
 0x316   :  { %v975_v11 = vmul.f32 1.442695, %v973_v10 }
 0x318   :  { %1467 = vpow2.f32 %v975_v11 }
 0x31b   :  { %v972_v12 = vpop.xlane.xlu0 %971 }
 0x31c   :  { %v974_v13 = vsub.f32 %v967_v8, %v972_v12 }
 0x31e   :  { %v1468_v14 = vpop.eup %1467  ;;  %v977_v15 = vmul.f32 1.442695, %v974_v13 }
 0x31f   :  { %979 = vadd.xlane.f32.xlu1 %v1468_v14 }
 0x320   :  { %1469 = vpow2.f32 %v977_v15 }
 0x326   :  { %v1470_v16 = vpop.eup %1469 }
 0x327   :  { %981 = vadd.xlane.f32.xlu1 %v1470_v16 }
 0x392   :  { %v980_v17 = vpop.xlane.xlu1 %979 }
 0x393   :  { %1471 = vrcp.f32 %v980_v17 }
 0x399   :  { %v1472_v18 = vpop.eup %1471 }
 0x39a   :  { %v985_v19 = vmul.f32 %v1472_v18, %v980_v17  ;;  %v982_v20 = vpop.xlane.xlu1 %981 }
 0x39b   :  { %1473 = vrcp.f32 %v982_v20 }
 0x39c   :  { %v987_v21 = vsub.f32 2.0, %v985_v19 }
 0x39e   :  { %v989_v22 = vmul.f32 %v1472_v18, %v987_v21 }
 0x3a0   :  { %v991_v23 = vmul.f32 %v1468_v14, %v989_v22 }
 0x3a1   :  { %v1474_v24 = vpop.eup %1473 }
 0x3a2   :  { %993 = vst [vmem:[#allocation13] sm:$0xff] %v991_v23  ;;  %v986_v25 = vmul.f32 %v1474_v24, %v982_v20 }
 0x3a4   :  { %v988_v26 = vsub.f32 2.0, %v986_v25 }
 0x3a6   :  { %v990_v27 = vmul.f32 %v1474_v24, %v988_v26 }
 0x3a8   :  { %v992_v28 = vmul.f32 %v1470_v16, %v990_v27 }
 0x3aa   :  { %994 = vst [vmem:[#allocation13 + $0x8] sm:$0xff] %v992_v28 }
 0x3ab   :  { %1007 = dma.vmem_to_hbm [thread:$0]  %s1000_s22, 256, %s1002_s23, [#allocation4], %s1654_s17, %s1654_s17, %s1655_s18  }
 0x3ac   :  { %1651 = dma.done.wait [#allocation4], 256  }
 0x3ad   :  { %1652 = vsyncadd [#allocation4], 4294967040 }
 0x3ae   :  { %1012 = vsyncpa [#allocation3], 1 }
 0x3af   :  { %1013 = vsyncpa [#allocation6], 1 }
 0x3b0   :  { %1014 = vsyncpa [#allocation9], 1 }
 0x3b1   :  { %1015 = vsyncpa [#allocation12], 1 }
 0x3b2   :  { %1016 = vsyncpa [#allocation4], 1 }

</bundles_post_ra>
